<compile_context>
chip_gen: v7x
topology: tpu7x:2x2x1
jax: 0.10.0
libtpu: 0.0.40
codegen_flags: <defaults>
</compile_context>

<pallas_src>
import jax
import jax.numpy as jnp
from jax import lax
from jax.experimental import pallas as pl
from jax.experimental.pallas import tpu as pltpu

HIDDEN1 = 64
HIDDEN2 = 32
LANE = 128  # TPU lane width

# Per-batch-row VMEM bytes (everything lane-padded to 128 lanes, f32):
#   x tile 2 bufs * 512 B + out tile 2 bufs * 512 B + h1/h2/logits ~3 * 512 B.
_VMEM_BYTES_PER_ROW = 4096
_VMEM_TILE_BUDGET = 24 << 20          # leave headroom under the scoped limit below
TB_MAX = (_VMEM_TILE_BUDGET // _VMEM_BYTES_PER_ROW) // LANE * LANE   # = 6144
_VMEM_LIMIT_BYTES = 32 << 20          # raises v5e's 16 MiB default; default on v6e/v7x


def _cdiv(a, b):
    return -(-a // b)


def _round_up(a, b):
    return _cdiv(a, b) * b


def _mlp_kernel(x_ref, w1_ref, b1_ref, w2_ref, b2_ref, w3_ref, b3_ref, o_ref):
    x = x_ref[...]                                       # (tb, in)  f32
    nt = (((1,), (1,)), ((), ()))                        # contract last axes (NT matmul)

    # fc1 + ReLU:  (tb, in) x (64, in) -> (tb, 64)
    h1 = lax.dot_general(x, w1_ref[...], nt, preferred_element_type=jnp.float32)
    h1 = jnp.maximum(h1 + b1_ref[...], 0.0)

    # fc2 + ReLU:  (tb, 64) x (32, 64) -> (tb, 32)
    h2 = lax.dot_general(h1, w2_ref[...], nt, preferred_element_type=jnp.float32)
    h2 = jnp.maximum(h2 + b2_ref[...], 0.0)

    # fc3 + Sigmoid:  (tb, 32) x (out, 32) -> (tb, out)
    logits = lax.dot_general(h2, w3_ref[...], nt, preferred_element_type=jnp.float32)
    logits = logits + b3_ref[...]
    # Exact sigmoid (stays in [0, 1]); exp goes to the EUP slot, output is tiny.
    o_ref[...] = (1.0 / (1.0 + jnp.exp(-logits))).astype(o_ref.dtype)


def user_association_forward(x, params, *, min_pallas_batch=1024):
    """x: (B, input_size) f32.  params: PyTorch nn.Linear layout:
       wN (out_features, in_features) f32; bN stored as a (1, out_features) row."""
    w1, b1, w2, b2, w3, b3 = (params[k] for k in ("w1", "b1", "w2", "b2", "w3", "b3"))
    B, in_size = x.shape
    out_size = w3.shape[0]

    # Small-batch fast path: one fused XLA op beats a pallas_call launch.
    if B < min_pallas_batch:
        h = jnp.maximum(x @ w1.T + b1, 0.0)
        h = jnp.maximum(h @ w2.T + b2, 0.0)
        return (1.0 / (1.0 + jnp.exp(-(h @ w3.T + b3)))).astype(x.dtype)

    # Split B evenly across the fewest steps that respect the VMEM budget;
    # keep >= 2 steps when possible so v7x's two TensorCores both get work.
    n_steps = _cdiv(B, TB_MAX)
    if n_steps == 1 and B >= 2 * LANE:
        n_steps = 2
    tb = _round_up(_cdiv(B, n_steps), LANE)
    b_pad = n_steps * tb
    x_in = x if b_pad == B else jnp.pad(x, ((0, b_pad - B), (0, 0)))

    resident = lambda shape: pl.BlockSpec(shape, lambda i: (0, 0))  # VMEM-resident

    out = pl.pallas_call(
        _mlp_kernel,
        out_shape=jax.ShapeDtypeStruct((b_pad, out_size), x.dtype),
        grid=(n_steps,),
        in_specs=[
            pl.BlockSpec((tb, in_size), lambda i: (i, 0)),   # x tile (pipelined)
            resident(w1.shape), resident(b1.shape),
            resident(w2.shape), resident(b2.shape),
            resident(w3.shape), resident(b3.shape),
        ],
        out_specs=pl.BlockSpec((tb, out_size), lambda i: (i, 0)),
        compiler_params=pltpu.CompilerParams(
            dimension_semantics=("parallel",),               # v7x: shard batch over both TCs
            vmem_limit_bytes=_VMEM_LIMIT_BYTES,
        ),
    )(x_in, w1, b1, w2, b2, w3, b3)

    # Padded batch rows (if any) contain garbage and are sliced away.
    return out if b_pad == B else out[:B]


def init_params(key, input_size, output_size):
    """Deterministic synthetic init matching nn.Linear: W (out, in) U(-1/sqrt(fan_in), ...);
       bias stored as a (1, out) row for batch-major broadcast."""
    ks = jax.random.split(key, 6)

    def linear(kw, kb, fan_in, fan_out):
        bound = float(fan_in) ** -0.5
        w = jax.random.uniform(kw, (fan_out, fan_in), jnp.float32, -bound, bound)
        b = jax.random.uniform(kb, (1, fan_out), jnp.float32, -bound, bound)
        return w, b

    w1, b1 = linear(ks[0], ks[1], input_size, HIDDEN1)
    w2, b2 = linear(ks[2], ks[3], HIDDEN1, HIDDEN2)
    w3, b3 = linear(ks[4], ks[5], HIDDEN2, output_size)
    return {"w1": w1, "b1": b1, "w2": w2, "b2": b2, "w3": w3, "b3": b3}


if __name__ == "__main__":
    key = jax.random.PRNGKey(0)
    k_params, k_x = jax.random.split(key)

    input_size = 16     # e.g. per-user channel-state features
    output_size = 4     # e.g. candidate base stations
    params = init_params(k_params, input_size, output_size)

    def ref_fwd(xx):    # plain f32 XLA reference (same math as the PyTorch forward)
        h = jnp.maximum(xx @ params["w1"].T + params["b1"], 0.0)
        h = jnp.maximum(h @ params["w2"].T + params["b2"], 0.0)
        return 1.0 / (1.0 + jnp.exp(-(h @ params["w3"].T + params["b3"])))

    # 1) Small lane-aligned batch through the Pallas path (forced).
    x1 = jax.random.normal(jax.random.fold_in(k_x, 0), (256, input_size), jnp.float32)
    o1 = jax.block_until_ready(user_association_forward(x1, params, min_pallas_batch=0))
    assert o1.shape == (256, output_size)
    # MXU default-precision f32 matmuls may round through bf16 passes -> modest tolerance.
    assert jnp.allclose(o1, ref_fwd(x1), atol=2e-2, rtol=2e-2), \
        float(jnp.max(jnp.abs(o1 - ref_fwd(x1))))
    assert bool(jnp.all((o1 >= 0.0) & (o1 <= 1.0)))   # exact sigmoid -> true probabilities

    # 2) Ragged batch (not a multiple of the tile) exercises the padding/slicing path.
    x2 = jax.random.normal(jax.random.fold_in(k_x, 1), (1000, input_size), jnp.float32)
    o2 = jax.block_until_ready(user_association_forward(x2, params, min_pallas_batch=0))
    assert o2.shape == (1000, output_size)
    assert jnp.allclose(o2, ref_fwd(x2), atol=2e-2, rtol=2e-2)

    print("KERNEL_OK")
</pallas_src>

<mosaic_0001>
module attributes {stable_mosaic.version = 11 : i64} {
  func.func @_mlp_kernel(%arg0: i32, %arg1: memref<128x16xf32, #tpu.memory_space<vmem>>, %arg2: memref<64x16xf32, #tpu.memory_space<vmem>>, %arg3: memref<1x64xf32, #tpu.memory_space<vmem>>, %arg4: memref<32x64xf32, #tpu.memory_space<vmem>>, %arg5: memref<1x32xf32, #tpu.memory_space<vmem>>, %arg6: memref<4x32xf32, #tpu.memory_space<vmem>>, %arg7: memref<1x4xf32, #tpu.memory_space<vmem>>, %arg8: memref<128x4xf32, #tpu.memory_space<vmem>>) attributes {dimension_semantics = [#tpu.dimension_semantics<parallel>], iteration_bounds = array<i64: 2>, scalar_prefetch = 0 : i64, scratch_operands = 0 : i64, tpu.core_type = #tpu.core_type<tc>, window_params = [{transform_indices = @transform_0, window_bounds = array<i64: 128, 16>}, {pipeline_mode = #tpu.pipeline_mode<synchronous>, transform_indices = @transform_1, window_bounds = array<i64: 64, 16>}, {pipeline_mode = #tpu.pipeline_mode<synchronous>, transform_indices = @transform_2, window_bounds = array<i64: 1, 64>}, {pipeline_mode = #tpu.pipeline_mode<synchronous>, transform_indices = @transform_3, window_bounds = array<i64: 32, 64>}, {pipeline_mode = #tpu.pipeline_mode<synchronous>, transform_indices = @transform_4, window_bounds = array<i64: 1, 32>}, {pipeline_mode = #tpu.pipeline_mode<synchronous>, transform_indices = @transform_5, window_bounds = array<i64: 4, 32>}, {pipeline_mode = #tpu.pipeline_mode<synchronous>, transform_indices = @transform_6, window_bounds = array<i64: 1, 4>}, {transform_indices = @transform_7, window_bounds = array<i64: 128, 4>}]} {
    %c0 = arith.constant 0 : index
    %c0_0 = arith.constant 0 : index
    %0 = vector.load %arg1[%c0, %c0_0] : memref<128x16xf32, #tpu.memory_space<vmem>>, vector<128x16xf32>
    %c0_1 = arith.constant 0 : index
    %c0_2 = arith.constant 0 : index
    %1 = vector.load %arg2[%c0_1, %c0_2] : memref<64x16xf32, #tpu.memory_space<vmem>>, vector<64x16xf32>
    %cst = arith.constant dense<0.000000e+00> : vector<128x64xf32>
    %2 = tpu.matmul %0, %1, %cst {dimension_numbers = #tpu.dot_dimension_numbers<[1], [1], [0], [0], [0, 0, 1, 0], [], []>} : vector<128x16xf32>, vector<64x16xf32>, vector<128x64xf32> -> vector<128x64xf32>
    %c0_3 = arith.constant 0 : index
    %c0_4 = arith.constant 0 : index
    %3 = vector.load %arg3[%c0_3, %c0_4] : memref<1x64xf32, #tpu.memory_space<vmem>>, vector<1x64xf32>
    %4 = vector.broadcast %3 : vector<1x64xf32> to vector<128x64xf32>
    %5 = arith.addf %2, %4 : vector<128x64xf32>
    %cst_5 = arith.constant 0.000000e+00 : f32
    %6 = vector.broadcast %cst_5 : f32 to vector<128x64xf32>
    %7 = arith.maximumf %5, %6 : vector<128x64xf32>
    %c0_6 = arith.constant 0 : index
    %c0_7 = arith.constant 0 : index
    %8 = vector.load %arg4[%c0_6, %c0_7] : memref<32x64xf32, #tpu.memory_space<vmem>>, vector<32x64xf32>
    %cst_8 = arith.constant dense<0.000000e+00> : vector<128x32xf32>
    %9 = tpu.matmul %7, %8, %cst_8 {dimension_numbers = #tpu.dot_dimension_numbers<[1], [1], [0], [0], [0, 0, 1, 0], [], []>} : vector<128x64xf32>, vector<32x64xf32>, vector<128x32xf32> -> vector<128x32xf32>
    %c0_9 = arith.constant 0 : index
    %c0_10 = arith.constant 0 : index
    %10 = vector.load %arg5[%c0_9, %c0_10] : memref<1x32xf32, #tpu.memory_space<vmem>>, vector<1x32xf32>
    %11 = vector.broadcast %10 : vector<1x32xf32> to vector<128x32xf32>
    %12 = arith.addf %9, %11 : vector<128x32xf32>
    %cst_11 = arith.constant 0.000000e+00 : f32
    %13 = vector.broadcast %cst_11 : f32 to vector<128x32xf32>
    %14 = arith.maximumf %12, %13 : vector<128x32xf32>
    %c0_12 = arith.constant 0 : index
    %c0_13 = arith.constant 0 : index
    %15 = vector.load %arg6[%c0_12, %c0_13] : memref<4x32xf32, #tpu.memory_space<vmem>>, vector<4x32xf32>
    %cst_14 = arith.constant dense<0.000000e+00> : vector<128x4xf32>
    %16 = tpu.matmul %14, %15, %cst_14 {dimension_numbers = #tpu.dot_dimension_numbers<[1], [1], [0], [0], [0, 0, 1, 0], [], []>} : vector<128x32xf32>, vector<4x32xf32>, vector<128x4xf32> -> vector<128x4xf32>
    %c0_15 = arith.constant 0 : index
    %c0_16 = arith.constant 0 : index
    %17 = vector.load %arg7[%c0_15, %c0_16] : memref<1x4xf32, #tpu.memory_space<vmem>>, vector<1x4xf32>
    %18 = vector.broadcast %17 : vector<1x4xf32> to vector<128x4xf32>
    %19 = arith.addf %16, %18 : vector<128x4xf32>
    %cst_17 = arith.constant 0.000000e+00 : f32
    %20 = vector.broadcast %cst_17 : f32 to vector<128x4xf32>
    %21 = arith.subf %20, %19 : vector<128x4xf32>
    %22 = math.exp %21 : vector<128x4xf32>
    %cst_18 = arith.constant 1.000000e+00 : f32
    %23 = vector.broadcast %cst_18 : f32 to vector<128x4xf32>
    %24 = arith.addf %23, %22 : vector<128x4xf32>
    %cst_19 = arith.constant 1.000000e+00 : f32
    %25 = vector.broadcast %cst_19 : f32 to vector<128x4xf32>
    %26 = arith.divf %25, %24 : vector<128x4xf32>
    %c0_20 = arith.constant 0 : index
    %c0_21 = arith.constant 0 : index
    %27 = vector.load %arg8[%c0_20, %c0_21] : memref<128x4xf32, #tpu.memory_space<vmem>>, vector<128x4xf32>
    tpu.vector_store %arg8[%c0_20, %c0_21], %26 {strides = array<i32>} : memref<128x4xf32, #tpu.memory_space<vmem>>, vector<128x4xf32>,
    return
  }
  func.func @transform_0(%arg0: i32) -> (i32, i32) {
    %c0_i32 = arith.constant 0 : i32
    %c0_i32_0 = arith.constant 0 : i32
    return %arg0, %c0_i32 : i32, i32
  }
  func.func @transform_1(%arg0: i32) -> (i32, i32) {
    %c0_i32 = arith.constant 0 : i32
    %c0_i32_0 = arith.constant 0 : i32
    %c0_i32_1 = arith.constant 0 : i32
    return %c0_i32, %c0_i32_0 : i32, i32
  }
  func.func @transform_2(%arg0: i32) -> (i32, i32) {
    %c0_i32 = arith.constant 0 : i32
    %c0_i32_0 = arith.constant 0 : i32
    %c0_i32_1 = arith.constant 0 : i32
    return %c0_i32, %c0_i32_0 : i32, i32
  }
  func.func @transform_3(%arg0: i32) -> (i32, i32) {
    %c0_i32 = arith.constant 0 : i32
    %c0_i32_0 = arith.constant 0 : i32
    %c0_i32_1 = arith.constant 0 : i32
    return %c0_i32, %c0_i32_0 : i32, i32
  }
  func.func @transform_4(%arg0: i32) -> (i32, i32) {
    %c0_i32 = arith.constant 0 : i32
    %c0_i32_0 = arith.constant 0 : i32
    %c0_i32_1 = arith.constant 0 : i32
    return %c0_i32, %c0_i32_0 : i32, i32
  }
  func.func @transform_5(%arg0: i32) -> (i32, i32) {
    %c0_i32 = arith.constant 0 : i32
    %c0_i32_0 = arith.constant 0 : i32
    %c0_i32_1 = arith.constant 0 : i32
    return %c0_i32, %c0_i32_0 : i32, i32
  }
  func.func @transform_6(%arg0: i32) -> (i32, i32) {
    %c0_i32 = arith.constant 0 : i32
    %c0_i32_0 = arith.constant 0 : i32
    %c0_i32_1 = arith.constant 0 : i32
    return %c0_i32, %c0_i32_0 : i32, i32
  }
  func.func @transform_7(%arg0: i32) -> (i32, i32) {
    %c0_i32 = arith.constant 0 : i32
    %c0_i32_0 = arith.constant 0 : i32
    return %arg0, %c0_i32 : i32, i32
  }
}

</mosaic_0001>

<bundles_post_ra>
// kernel: tpu_custom_call.1
= control target key start
LH: loop header
LB: loop body
LE: loop exit
PB: predicated region body
PF: predicated region fallthrough
CT: control target
= control target key end

     0   :  { %s1548_s24 = smov 0   ;;  %s1784_s0 = inlined_call_operand.vmem [shape: f32[256,16], index: 0, kind: input, shape index: {}]   ;;  %s1785_s1 = inlined_call_operand.vmem [shape: f32[64,16], index: 1, kind: input, shape index: {}]   ;;  %s1786_s2 = inlined_call_operand.vmem [shape: f32[1,64], index: 2, kind: input, shape index: {}]   ;;  %s1787_s3 = inlined_call_operand.vmem [shape: f32[32,64], index: 3, kind: input, shape index: {}]   ;;  %s1788_s4 = inlined_call_operand.vmem [shape: f32[1,32], index: 4, kind: input, shape index: {}]   ;;  %s1789_s5 = inlined_call_operand.vmem [shape: f32[4,32], index: 5, kind: input, shape index: {}]   ;;  %s1790_s6 = inlined_call_operand.vmem [shape: f32[1,4], index: 6, kind: input, shape index: {}]   ;;  %s1791_s7 = inlined_call_operand.vmem [shape: f32[256,4], index: 7, kind: output, shape index: {}]  }
   0x1 LB: > { %s1154_s25 = sadd.s32 4294967295, %s1506_s24   ;;  %p1158_p0 = scmp.ge.s32.totalorder %s1506_s24, 1  ;;  %s1506_s24 = sphi %s1548_s24, %s17_s24  }
   0x2   : > { %p238_p1 = scmp.lt.s32.totalorder %s1506_s24, 3 }
   0x4   : > { %p239_p2 = pnand %p1158_p0, %p238_p1 }
   0x5   : > { %v298_v0 = vld [vmem:[%s1785_s1] sm:$0xff] (!%p239_p2)  ;;  %v299_v1 = vld [vmem:[%s1785_s1 + $0x8] sm:$0xff] (!%p239_p2)  ;;  %vm313_vm0 = vcmask (!%p239_p2), 130048   ;;  %v300_v2 = vld [vmem:[%s1785_s1 + $0x10] sm:$0xff] (!%p239_p2)  ;;  %s1159_s9 = sshll.u32 (!%p239_p2), %s1154_s25, 4  ;;  %vm558_vm2 = vcmask (!%p239_p2), 523264  }
   0x6   : > { %242 = sbr.rel (%p239_p2) target bundleno = 750 (0x2ee), region = 48  ;;  %v1388_v3 = vpack.c.bf16 (!%p239_p2), %v299_v1, %v298_v0  ;;  %vm1567_vm1 = vmpackc.low (!%p239_p2), %vm313_vm0, %vm313_vm0  ;;  %v301_v5 = vld [vmem:[%s1785_s1 + $0x18] sm:$0xff] (!%p239_p2)  ;;  %p271_p3 = scmp.lt.s32.totalorder (!%p239_p2), %s1159_s9, 31  ;;  %v547_v7 = vld [vmem:[%s1787_s3] sm:$0xff] (!%p239_p2)  ;;  %vm788_vm4 = vcmask (!%p239_p2), 261120   ;;  %vm1081_vm5 = vcmask (!%p239_p2), 31744  }
   0x7   : > { %v1394_v6 = vpack.c.bf16 (!%p239_p2), %v301_v5, %v300_v2  ;;  %v548_v8 = vld [vmem:[%s1787_s3 + $0x8] sm:$0xff] (!%p239_p2)  ;;  %v549_v10 = vld [vmem:[%s1787_s3 + $0x10] sm:$0xff] (!%p239_p2)  ;;  %v550_v11 = vld [vmem:[%s1787_s3 + $0x18] sm:$0xff] (!%p239_p2) }
   0x8   : > { %1390 = vmatprep.subr.msk.bf16.mxu0 (!%p239_p2), %vm1567_vm1, %v1388_v3  ;;  %v1412_v9 = vpack.c.bf16 (!%p239_p2), %v548_v8, %v547_v7  ;;  %vm1597_vm3 = vmpackc.low (!%p239_p2), %vm558_vm2, %vm558_vm2  ;;  %v302_v13 = vld [vmem:[%s1785_s1 + $0x20] sm:$0xff] (!%p239_p2)  ;;  %v303_v14 = vld [vmem:[%s1785_s1 + $0x28] sm:$0xff] (!%p239_p2)  ;;  %v1418_v15 = vpack.c.bf16 (!%p239_p2), %v550_v11, %v549_v10 }
   0x9   : > { %1393 = vmatpush3.bf16.xpose.msk.msra.mxu0 (!%p239_p2), %vm1567_vm1, %v1388_v3  ;;  %v1400_v17 = vpack.c.bf16 (!%p239_p2), %v303_v14, %v302_v13  ;;  %v304_v18 = vld [vmem:[%s1785_s1 + $0x30] sm:$0xff] (!%p239_p2)  ;;  %v305_v19 = vld [vmem:[%s1785_s1 + $0x38] sm:$0xff] (!%p239_p2)  ;;  %v780_v36 = vld [vmem:[%s1789_s5] sm:$0xf] (!%p239_p2) }
   0xa   : > { %1396 = vmatprep.subr.msk.bf16.mxu0 (!%p239_p2), %vm1567_vm1, %v1394_v6  ;;  %1424 = vmatprep.subr.msk.bf16.mxu1 (!%p239_p2), %vm1597_vm3, %v1412_v9  ;;  %v1406_v20 = vpack.c.bf16 (!%p239_p2), %v305_v19, %v304_v18  ;;  %v1163_v37 = vld [vmem:[%s1786_s2] ss:$0 sm:$0xff] (!%p239_p2) }
   0xb   : > { %1426 = vmatpush3.bf16.xpose.msk.msra.mxu1 (!%p239_p2), %vm1597_vm3, %v1412_v9 }
   0xc   : > { %1425 = vmatprep.subr.msk.bf16.mxu1 (!%p239_p2), %vm1597_vm3, %v1418_v15 }
   0xd   : > { %s1797_s9 = smov (!%p271_p3, %s1159_s9), 31 }
   0xe   : > { %s1160_s20 = sshll.u32 %s1797_s9, 3 }
   0xf   : > { %s1612_s28 = scalar_lea.vmem %s1784_s0, %s1160_s20  ;;  %s1745_s22 = scalar_lea.vmem %s1791_s7, %s1160_s20 }
  0x10   : > { %v282_v16 = vld [vmem:[%s1612_s28] sm:$0xff]  ;;  %v283_v21 = vld [vmem:[%s1612_s28 + $0x8] sm:$0xff]  ;;  %v284_v22 = vld [vmem:[%s1612_s28 + $0x10] sm:$0xff] }
  0x11   : > { %1306 = vmatprep.mubr.msk.f32.mxu0 %vm313_vm0, %v282_v16  ;;  %1399 = vmatpush3.bf16.xpose.msk.msra.mxu0 %vm1567_vm1, %v1394_v6  ;;  %v285_v23 = vld [vmem:[%s1612_s28 + $0x18] sm:$0xff]  ;;  %v286_v24 = vld [vmem:[%s1612_s28 + $0x20] sm:$0xff]  ;;  %v287_v25 = vld [vmem:[%s1612_s28 + $0x28] sm:$0xff] }
  0x12   : > { %1402 = vmatprep.subr.msk.bf16.mxu0 %vm1567_vm1, %v1400_v17  ;;  %v288_v26 = vld [vmem:[%s1612_s28 + $0x30] sm:$0xff]  ;;  %v289_v27 = vld [vmem:[%s1612_s28 + $0x38] sm:$0xff]  ;;  %v290_v28 = vld [vmem:[%s1612_s28 + $0x40] sm:$0xff] }
  0x13   : > { %1427 = vmatpush3.bf16.xpose.msk.msra.mxu1 %vm1597_vm3, %v1418_v15  ;;  %v291_v29 = vld [vmem:[%s1612_s28 + $0x48] sm:$0xff]  ;;  %v292_v30 = vld [vmem:[%s1612_s28 + $0x50] sm:$0xff]  ;;  %v293_v31 = vld [vmem:[%s1612_s28 + $0x58] sm:$0xff] }
  0x14   : > { %v294_v32 = vld [vmem:[%s1612_s28 + $0x60] sm:$0xff]  ;;  %v295_v33 = vld [vmem:[%s1612_s28 + $0x68] sm:$0xff]  ;;  %v296_v34 = vld [vmem:[%s1612_s28 + $0x70] sm:$0xff]  ;;  %1362 = vmatprep.subr.msk.mxu1 %vm788_vm4, %v780_v36 }
  0x15   : > { %v297_v35 = vld [vmem:[%s1612_s28 + $0x78] sm:$0xff] }
  0x19   : > { %1405 = vmatpush3.bf16.xpose.msk.msra.mxu0 %vm1567_vm1, %v1400_v17 }
  0x1a   : > { %1408 = vmatprep.subr.msk.bf16.mxu0 %vm1567_vm1, %v1406_v20 }
  0x21   : > { %1411 = vmatpush3.bf16.xpose.msk.msra.mxu0 %vm1567_vm1, %v1406_v20 }
  0x22   : > { %1414 = vmatprep.subr.msk.bf16.mxu0 %vm1597_vm3, %v1412_v9 }
  0x28   : > { %1307 = vmatmul.mubr.msk.f32.vlgmr.msra.gmra.mrb[0].mxu0 %vm313_vm0, %v283_v21 }
  0x29   : > { %1309 = vmatprep.mubr.msk.f32.mxu0 %vm313_vm0, %v284_v22  ;;  %1417 = vmatpush3.bf16.xpose.msk.msra.mxu0 %vm1597_vm3, %v1412_v9  ;;  %v1188_v22 = vld [vmem:[%s1788_s4] ss:$0 sm:$0xff] }
  0x2a   : > { %1420 = vmatprep.subr.msk.bf16.mxu0 %vm1597_vm3, %v1418_v15 }
  0x2c   : > { %1310 = vmatmul.mubr.msk.f32.gmra.mrb[2].mxu0 %vm313_vm0, %v285_v23 }
  0x2d   : > { %1312 = vmatprep.mubr.msk.f32.mxu0 %vm313_vm0, %v286_v24 }
  0x30   : > { %1313 = vmatmul.mubr.msk.f32.gmra.mrb[4].mxu0 %vm313_vm0, %v287_v25 }
  0x31   : > { %1315 = vmatprep.mubr.msk.f32.mxu0 %vm313_vm0, %v288_v26  ;;  %1423 = vmatpush3.bf16.xpose.msk.msra.mxu0 %vm1597_vm3, %v1418_v15 }
  0x34   : > { %1316 = vmatmul.mubr.msk.f32.gmra.mrb[6].mxu0 %vm313_vm0, %v289_v27 }
  0x35   : > { %1318 = vmatprep.mubr.msk.f32.mxu0 %vm313_vm0, %v290_v28 }
  0x38   : > { %1319 = vmatmul.mubr.msk.f32.gmra.mrb[8].mxu0 %vm313_vm0, %v291_v29 }
  0x39   : > { %1321 = vmatprep.mubr.msk.f32.mxu0 %vm313_vm0, %v292_v30 }
  0x3c   : > { %1322 = vmatmul.mubr.msk.f32.gmra.mrb[10].mxu0 %vm313_vm0, %v293_v31 }
  0x3d   : > { %1324 = vmatprep.mubr.msk.f32.mxu0 %vm313_vm0, %v294_v32 }
  0x40   : > { %1325 = vmatmul.mubr.msk.f32.gmra.mrb[12].mxu0 %vm313_vm0, %v295_v33 }
  0x41   : > { %1327 = vmatprep.mubr.msk.f32.mxu0 %vm313_vm0, %v296_v34 }
  0x44   : > { %1328 = vmatmul.mubr.msk.f32.gmra.mrb[14].mxu0 %vm313_vm0, %v297_v35 }
  0xfb   : > { %v1308_v38 = vpop.f32.mrb[0].mxu0 }
  0xfc   : > { %v458_v39 = vadd.f32 %v1308_v38, %v1163_v37  ;;  %v452_v40 = vpop.f32.mrb[1].mxu0 }
  0xfd   : > { %v453_v41 = vadd.f32 %v1163_v37, %v452_v40 }
  0xfe   : > { %v532_v44 = vmax.f32 %v458_v39, 0.0 }
  0xff   : > { %v531_v42 = vmax.f32 %v453_v41, 0.0  ;;  %v1311_v43 = vpop.f32.mrb[2].mxu0 }
 0x100   : > { %v468_v45 = vadd.f32 %v1311_v43, %v1163_v37  ;;  %v462_v46 = vpop.f32.mrb[3].mxu0 }
 0x101   : > { %v463_v47 = vadd.f32 %v1163_v37, %v462_v46  ;;  %1338 = vmatprep.mubr.msk.f32.mxu0 %vm558_vm2, %v531_v42 }
 0x102   : > { %1339 = vmatmul.mubr.msk.f32.vlgmr.msra.gmra.mrb[16].mxu0 %vm558_vm2, %v532_v44  ;;  %v534_v50 = vmax.f32 %v468_v45, 0.0 }
 0x103   : > { %v533_v48 = vmax.f32 %v463_v47, 0.0  ;;  %v1314_v49 = vpop.f32.mrb[4].mxu0 }
 0x104   : > { %v478_v51 = vadd.f32 %v1314_v49, %v1163_v37  ;;  %v472_v52 = vpop.f32.mrb[5].mxu0 }
 0x105   : > { %v473_v53 = vadd.f32 %v1163_v37, %v472_v52  ;;  %1341 = vmatprep.mubr.msk.f32.mxu0 %vm558_vm2, %v533_v48 }
 0x106   : > { %1342 = vmatmul.mubr.msk.f32.gmra.mrb[18].mxu0 %vm558_vm2, %v534_v50  ;;  %v536_v56 = vmax.f32 %v478_v51, 0.0 }
 0x107   : > { %v535_v54 = vmax.f32 %v473_v53, 0.0  ;;  %v1317_v55 = vpop.f32.mrb[6].mxu0 }
 0x108   : > { %v488_v57 = vadd.f32 %v1317_v55, %v1163_v37  ;;  %v482_v58 = vpop.f32.mrb[7].mxu0 }
 0x109   : > { %v483_v59 = vadd.f32 %v1163_v37, %v482_v58  ;;  %1344 = vmatprep.mubr.msk.f32.mxu1 %vm558_vm2, %v535_v54 }
 0x10a   : > { %1345 = vmatmul.mubr.msk.f32.vlgmr.msra.gmra.mrb[0].mxu1 %vm558_vm2, %v536_v56  ;;  %v538_v62 = vmax.f32 %v488_v57, 0.0 }
 0x10b   : > { %v537_v60 = vmax.f32 %v483_v59, 0.0  ;;  %v1320_v61 = vpop.f32.mrb[8].mxu0  ;;  %1363 = vmatpush3.xpose.msk.msra.mxu1 %vm788_vm4, %v780_v36 }
 0x10c   : > { %v498_v63 = vadd.f32 %v1320_v61, %v1163_v37  ;;  %v492_v0 = vpop.f32.mrb[9].mxu0 }
 0x10d   : > { %v493_v1 = vadd.f32 %v1163_v37, %v492_v0  ;;  %1347 = vmatprep.mubr.msk.f32.mxu1 %vm558_vm2, %v537_v60 }
 0x10e   : > { %1348 = vmatmul.mubr.msk.f32.gmra.mrb[2].mxu1 %vm558_vm2, %v538_v62  ;;  %v540_v4 = vmax.f32 %v498_v63, 0.0 }
 0x10f   : > { %v539_v2 = vmax.f32 %v493_v1, 0.0  ;;  %v1323_v3 = vpop.f32.mrb[10].mxu0 }
 0x110   : > { %v508_v5 = vadd.f32 %v1323_v3, %v1163_v37  ;;  %v502_v6 = vpop.f32.mrb[11].mxu0 }
 0x111   : > { %v503_v7 = vadd.f32 %v1163_v37, %v502_v6  ;;  %1350 = vmatprep.mubr.msk.f32.mxu1 %vm558_vm2, %v539_v2 }
 0x112   : > { %1351 = vmatmul.mubr.msk.f32.gmra.mrb[4].mxu1 %vm558_vm2, %v540_v4  ;;  %v542_v10 = vmax.f32 %v508_v5, 0.0 }
 0x113   : > { %v541_v8 = vmax.f32 %v503_v7, 0.0  ;;  %v1326_v9 = vpop.f32.mrb[12].mxu0  ;;  %v1724_v7 = vld [vmem:[%s1790_s6] ss:$0 sm:$0xff] }
 0x114   : > { %v518_v11 = vadd.f32 %v1326_v9, %v1163_v37  ;;  %v512_v12 = vpop.f32.mrb[13].mxu0 }
 0x115   : > { %v513_v13 = vadd.f32 %v1163_v37, %v512_v12  ;;  %1353 = vmatprep.mubr.msk.f32.mxu1 %vm558_vm2, %v541_v8 }
 0x116   : > { %1354 = vmatmul.mubr.msk.f32.gmra.mrb[6].mxu1 %vm558_vm2, %v542_v10  ;;  %v544_v16 = vmax.f32 %v518_v11, 0.0 }
 0x117   : > { %v543_v14 = vmax.f32 %v513_v13, 0.0  ;;  %v1329_v15 = vpop.f32.mrb[14].mxu0 }
 0x118   : > { %v528_v17 = vadd.f32 %v1329_v15, %v1163_v37  ;;  %v522_v18 = vpop.f32.mrb[15].mxu0 }
 0x119   : > { %v523_v19 = vadd.f32 %v1163_v37, %v522_v18  ;;  %1356 = vmatprep.mubr.msk.f32.mxu1 %vm558_vm2, %v543_v14 }
 0x11a   : > { %1357 = vmatmul.mubr.msk.f32.gmra.mrb[8].mxu1 %vm558_vm2, %v544_v16  ;;  %v546_v21 = vmax.f32 %v528_v17, 0.0 }
 0x11b   : > { %v545_v20 = vmax.f32 %v523_v19, 0.0 }
 0x11d   : > { %1359 = vmatprep.mubr.msk.f32.mxu1 %vm558_vm2, %v545_v20 }
 0x11e   : > { %1360 = vmatmul.mubr.msk.f32.gmra.mrb[10].mxu1 %vm558_vm2, %v546_v21 }
 0x1d5   : > { %v1340_v23 = vpop.f32.mrb[16].mxu0 }
 0x1d6   : > { %v691_v24 = vadd.f32 %v1340_v23, %v1188_v22  ;;  %v685_v25 = vpop.f32.mrb[17].mxu0 }
 0x1d7   : > { %v686_v26 = vadd.f32 %v1188_v22, %v685_v25 }
 0x1d8   : > { %v765_v29 = vmax.f32 %v691_v24, 0.0 }
 0x1d9   : > { %v764_v27 = vmax.f32 %v686_v26, 0.0  ;;  %v1343_v28 = vpop.f32.mrb[18].mxu0 }
 0x1da   : > { %v701_v30 = vadd.f32 %v1343_v28, %v1188_v22  ;;  %v695_v31 = vpop.f32.mrb[19].mxu0 }
 0x1db   : > { %v696_v32 = vadd.f32 %v1188_v22, %v695_v31  ;;  %1364 = vmatprep.mubr.msk.f32.mxu1 %vm788_vm4, %v764_v27 }
 0x1dc   : > { %1365 = vmatmul.mubr.msk.f32.vlgmr.msra.gmra.mrb[12].mxu1 %vm788_vm4, %v765_v29  ;;  %v767_v35 = vmax.f32 %v701_v30, 0.0 }
 0x1dd   : > { %v766_v33 = vmax.f32 %v696_v32, 0.0  ;;  %v1346_v34 = vpop.f32.mrb[0].mxu1 }
 0x1de   : > { %v711_v36 = vadd.f32 %v1346_v34, %v1188_v22  ;;  %v705_v37 = vpop.f32.mrb[1].mxu1 }
 0x1df   : > { %v706_v38 = vadd.f32 %v1188_v22, %v705_v37  ;;  %1367 = vmatprep.mubr.msk.f32.mxu1 %vm788_vm4, %v766_v33 }
 0x1e0   : > { %1368 = vmatmul.mubr.msk.f32.gmra.mrb[14].mxu1 %vm788_vm4, %v767_v35  ;;  %v769_v41 = vmax.f32 %v711_v36, 0.0 }
 0x1e1   : > { %v768_v39 = vmax.f32 %v706_v38, 0.0  ;;  %v1349_v40 = vpop.f32.mrb[2].mxu1 }
 0x1e2   : > { %v721_v42 = vadd.f32 %v1349_v40, %v1188_v22  ;;  %v715_v43 = vpop.f32.mrb[3].mxu1 }
 0x1e3   : > { %v716_v44 = vadd.f32 %v1188_v22, %v715_v43  ;;  %1370 = vmatprep.mubr.msk.f32.mxu1 %vm788_vm4, %v768_v39 }
 0x1e4   : > { %1371 = vmatmul.mubr.msk.f32.gmra.mrb[16].mxu1 %vm788_vm4, %v769_v41  ;;  %v771_v47 = vmax.f32 %v721_v42, 0.0 }
 0x1e5   : > { %v770_v45 = vmax.f32 %v716_v44, 0.0  ;;  %v1352_v46 = vpop.f32.mrb[4].mxu1 }
 0x1e6   : > { %v731_v48 = vadd.f32 %v1352_v46, %v1188_v22  ;;  %v725_v49 = vpop.f32.mrb[5].mxu1 }
 0x1e7   : > { %v726_v50 = vadd.f32 %v1188_v22, %v725_v49  ;;  %1373 = vmatprep.mubr.msk.f32.mxu1 %vm788_vm4, %v770_v45 }
 0x1e8   : > { %1374 = vmatmul.mubr.msk.f32.gmra.mrb[18].mxu1 %vm788_vm4, %v771_v47  ;;  %v773_v53 = vmax.f32 %v731_v48, 0.0 }
 0x1e9   : > { %v772_v51 = vmax.f32 %v726_v50, 0.0  ;;  %v1355_v52 = vpop.f32.mrb[6].mxu1 }
 0x1ea   : > { %v741_v54 = vadd.f32 %v1355_v52, %v1188_v22  ;;  %v735_v55 = vpop.f32.mrb[7].mxu1 }
 0x1eb   : > { %v736_v56 = vadd.f32 %v1188_v22, %v735_v55  ;;  %1376 = vmatprep.mubr.msk.f32.mxu1 %vm788_vm4, %v772_v51 }
 0x1ec   : > { %1377 = vmatmul.mubr.msk.f32.gmra.mrb[20].mxu1 %vm788_vm4, %v773_v53  ;;  %v775_v59 = vmax.f32 %v741_v54, 0.0 }
 0x1ed   : > { %v774_v57 = vmax.f32 %v736_v56, 0.0  ;;  %v1358_v58 = vpop.f32.mrb[8].mxu1 }
 0x1ee   : > { %v751_v60 = vadd.f32 %v1358_v58, %v1188_v22  ;;  %v745_v61 = vpop.f32.mrb[9].mxu1 }
 0x1ef   : > { %v746_v62 = vadd.f32 %v1188_v22, %v745_v61  ;;  %1379 = vmatprep.mubr.msk.f32.mxu1 %vm788_vm4, %v774_v57 }
 0x1f0   : > { %1380 = vmatmul.mubr.msk.f32.gmra.mrb[22].mxu1 %vm788_vm4, %v775_v59  ;;  %v777_v1 = vmax.f32 %v751_v60, 0.0 }
 0x1f1   : > { %v776_v63 = vmax.f32 %v746_v62, 0.0  ;;  %v1361_v0 = vpop.f32.mrb[10].mxu1 }
 0x1f2   : > { %v761_v2 = vadd.f32 %v1361_v0, %v1188_v22  ;;  %v755_v3 = vpop.f32.mrb[11].mxu1 }
 0x1f3   : > { %v756_v4 = vadd.f32 %v1188_v22, %v755_v3  ;;  %1382 = vmatprep.mubr.msk.f32.mxu1 %vm788_vm4, %v776_v63 }
 0x1f4   : > { %1383 = vmatmul.mubr.msk.f32.gmra.mrb[24].mxu1 %vm788_vm4, %v777_v1  ;;  %v779_v6 = vmax.f32 %v761_v2, 0.0 }
 0x1f5   : > { %v778_v5 = vmax.f32 %v756_v4, 0.0 }
 0x1f7   : > { %1385 = vmatprep.mubr.msk.f32.mxu1 %vm788_vm4, %v778_v5 }
 0x1f8   : > { %1386 = vmatmul.mubr.msk.f32.gmra.mrb[26].mxu1 %vm788_vm4, %v779_v6 }
 0x2af   : > { %v1366_v8 = vpop.f32.mrb[12].mxu1 }
 0x2b0   : > { %v912_v9 = vadd.f32 %v1366_v8, %v1724_v7  ;;  %v906_v10 = vpop.f32.mrb[13].mxu1 }
 0x2b1   : > { %v907_v11 = vadd.f32 %v1724_v7, %v906_v10 }
 0x2b2   : > { %v986_v12 = vsub.f32 0.0, %v912_v9 }
 0x2b3   : > { %v985_v13 = vsub.f32 0.0, %v907_v11  ;;  %v1369_v14 = vpop.f32.mrb[14].mxu1 }
 0x2b4   : > { %v1003_v15 = vmul.f32 1.442695, %v986_v12  ;;  %v922_v16 = vadd.f32 %v1369_v14, %v1724_v7  ;;  %v916_v17 = vpop.f32.mrb[15].mxu1 }
 0x2b5   : > { %v1001_v18 = vmul.f32 1.442695, %v985_v13  ;;  %v917_v19 = vadd.f32 %v1724_v7, %v916_v17 }
 0x2b6   : > { %1436 = vpow2.f32 %v1003_v15  ;;  %v988_v20 = vsub.f32 0.0, %v922_v16 }
 0x2b7   : > { %1438 = vpow2.f32 %v1001_v18  ;;  %v987_v21 = vsub.f32 0.0, %v917_v19  ;;  %v1372_v22 = vpop.f32.mrb[16].mxu1 }
 0x2b8   : > { %v1007_v23 = vmul.f32 1.442695, %v988_v20  ;;  %v932_v24 = vadd.f32 %v1372_v22, %v1724_v7  ;;  %v926_v25 = vpop.f32.mrb[17].mxu1 }
 0x2b9   : > { %v1005_v26 = vmul.f32 1.442695, %v987_v21  ;;  %v927_v27 = vadd.f32 %v1724_v7, %v926_v25 }
 0x2ba   : > { %1440 = vpow2.f32 %v1007_v23  ;;  %v990_v28 = vsub.f32 0.0, %v932_v24 }
 0x2bb   : > { %1442 = vpow2.f32 %v1005_v26  ;;  %v989_v29 = vsub.f32 0.0, %v927_v27  ;;  %v1375_v30 = vpop.f32.mrb[18].mxu1 }
 0x2bc   : > { %v1011_v31 = vmul.f32 1.442695, %v990_v28  ;;  %v942_v32 = vadd.f32 %v1375_v30, %v1724_v7  ;;  %v936_v33 = vpop.f32.mrb[19].mxu1 }
 0x2bd   : > { %v1009_v34 = vmul.f32 1.442695, %v989_v29  ;;  %v937_v35 = vadd.f32 %v1724_v7, %v936_v33 }
 0x2be   : > { %1444 = vpow2.f32 %v1011_v31  ;;  %v992_v36 = vsub.f32 0.0, %v942_v32 }
 0x2bf   : > { %1446 = vpow2.f32 %v1009_v34  ;;  %v991_v37 = vsub.f32 0.0, %v937_v35  ;;  %v1378_v38 = vpop.f32.mrb[20].mxu1 }
 0x2c0   : > { %v1437_v39 = vpop.eup %1436  ;;  %v1015_v40 = vmul.f32 1.442695, %v992_v36  ;;  %v952_v41 = vadd.f32 %v1378_v38, %v1724_v7  ;;  %v946_v42 = vpop.f32.mrb[21].mxu1 }
 0x2c1   : > { %v1439_v43 = vpop.eup %1438  ;;  %v1034_v44 = vadd.f32 1.0, %v1437_v39  ;;  %v1013_v45 = vmul.f32 1.442695, %v991_v37  ;;  %v947_v46 = vadd.f32 %v1724_v7, %v946_v42 }
 0x2c2   : > { %v1033_v47 = vadd.f32 1.0, %v1439_v43  ;;  %1448 = vpow2.f32 %v1015_v40  ;;  %v994_v48 = vsub.f32 0.0, %v952_v41 }
 0x2c3   : > { %1450 = vrcp.f32 %v1034_v44  ;;  %v993_v49 = vsub.f32 0.0, %v947_v46  ;;  %v1381_v50 = vpop.f32.mrb[22].mxu1 }
 0x2c4   : > { %v1441_v51 = vpop.eup %1440  ;;  %1452 = vrcp.f32 %v1033_v47  ;;  %v1019_v52 = vmul.f32 1.442695, %v994_v48  ;;  %v962_v53 = vadd.f32 %v1381_v50, %v1724_v7  ;;  %v956_v54 = vpop.f32.mrb[23].mxu1 }
 0x2c5   : > { %v1443_v55 = vpop.eup %1442  ;;  %v1036_v56 = vadd.f32 1.0, %v1441_v51  ;;  %1454 = vpow2.f32 %v1013_v45  ;;  %v1017_v57 = vmul.f32 1.442695, %v993_v49  ;;  %v957_v58 = vadd.f32 %v1724_v7, %v956_v54 }
 0x2c6   : > { %v1035_v59 = vadd.f32 1.0, %v1443_v55  ;;  %1456 = vpow2.f32 %v1019_v52  ;;  %v996_v60 = vsub.f32 0.0, %v962_v53 }
 0x2c7   : > { %1458 = vrcp.f32 %v1036_v56  ;;  %v995_v61 = vsub.f32 0.0, %v957_v58  ;;  %v1384_v62 = vpop.f32.mrb[24].mxu1 }
 0x2c8   : > { %v1445_v63 = vpop.eup %1444  ;;  %1460 = vrcp.f32 %v1035_v59  ;;  %v1023_v0 = vmul.f32 1.442695, %v996_v60  ;;  %v972_v1 = vadd.f32 %v1384_v62, %v1724_v7  ;;  %v966_v2 = vpop.f32.mrb[25].mxu1 }
 0x2c9   : > { %v1447_v3 = vpop.eup %1446  ;;  %v1038_v4 = vadd.f32 1.0, %v1445_v63  ;;  %1462 = vpow2.f32 %v1017_v57  ;;  %v1021_v5 = vmul.f32 1.442695, %v995_v61  ;;  %v967_v6 = vadd.f32 %v1724_v7, %v966_v2 }
 0x2ca   : > { %v1037_v8 = vadd.f32 1.0, %v1447_v3  ;;  %1464 = vpow2.f32 %v1023_v0  ;;  %v998_v9 = vsub.f32 0.0, %v972_v1 }
 0x2cb   : > { %1466 = vrcp.f32 %v1038_v4  ;;  %v997_v10 = vsub.f32 0.0, %v967_v6  ;;  %v1387_v11 = vpop.f32.mrb[26].mxu1 }
 0x2cc   : > { %v1449_v12 = vpop.eup %1448  ;;  %1468 = vrcp.f32 %v1037_v8  ;;  %v1027_v13 = vmul.f32 1.442695, %v998_v9  ;;  %v982_v14 = vadd.f32 %v1387_v11, %v1724_v7  ;;  %v976_v15 = vpop.f32.mrb[27].mxu1 }
 0x2cd   : > { %v1451_v16 = vpop.eup %1450  ;;  %v1040_v17 = vadd.f32 1.0, %v1449_v12  ;;  %1470 = vpow2.f32 %v1021_v5  ;;  %v1025_v18 = vmul.f32 1.442695, %v997_v10  ;;  %v977_v19 = vadd.f32 %v1724_v7, %v976_v15 }
 0x2ce   : > { %v1453_v20 = vpop.eup %1452  ;;  %1083 = vst.msk [vmem:[%s1745_s22 + $0x8] sm:$0xff] %vm1081_vm5, %v1451_v16  ;;  %1472 = vpow2.f32 %v1027_v13  ;;  %v1000_v21 = vsub.f32 0.0, %v982_v14 }
 0x2cf   : > { %v1455_v22 = vpop.eup %1454  ;;  %1082 = vst.msk [vmem:[%s1745_s22] sm:$0xff] %vm1081_vm5, %v1453_v20  ;;  %1474 = vrcp.f32 %v1040_v17  ;;  %v999_v23 = vsub.f32 0.0, %v977_v19 }
 0x2d0   : > { %v1457_v24 = vpop.eup %1456  ;;  %v1039_v25 = vadd.f32 1.0, %v1455_v22  ;;  %1476 = vpow2.f32 %v1025_v18  ;;  %v1031_v26 = vmul.f32 1.442695, %v1000_v21 }
 0x2d1   : > { %v1459_v27 = vpop.eup %1458  ;;  %v1042_v28 = vadd.f32 1.0, %v1457_v24  ;;  %v1029_v7 = vmul.f32 1.442695, %v999_v23 }
 0x2d2   : > { %v1461_v29 = vpop.eup %1460  ;;  %1085 = vst.msk [vmem:[%s1745_s22 + $0x18] sm:$0xff] %vm1081_vm5, %v1459_v27  ;;  %1478 = vrcp.f32 %v1039_v25 }
 0x2d3   : > { %v1463_v30 = vpop.eup %1462  ;;  %1084 = vst.msk [vmem:[%s1745_s22 + $0x10] sm:$0xff] %vm1081_vm5, %v1461_v29  ;;  %1480 = vrcp.f32 %v1042_v28 }
 0x2d4   : > { %v1465_v31 = vpop.eup %1464  ;;  %v1041_v32 = vadd.f32 1.0, %v1463_v30  ;;  %1482 = vpow2.f32 %v1031_v26 }
 0x2d5   : > { %v1467_v33 = vpop.eup %1466  ;;  %v1044_v34 = vadd.f32 1.0, %v1465_v31  ;;  %1484 = vpow2.f32 %v1029_v7 }
 0x2d6   : > { %v1469_v35 = vpop.eup %1468  ;;  %1087 = vst.msk [vmem:[%s1745_s22 + $0x28] sm:$0xff] %vm1081_vm5, %v1467_v33  ;;  %1486 = vrcp.f32 %v1041_v32 }
 0x2d7   : > { %v1471_v36 = vpop.eup %1470  ;;  %1086 = vst.msk [vmem:[%s1745_s22 + $0x20] sm:$0xff] %vm1081_vm5, %v1469_v35  ;;  %1488 = vrcp.f32 %v1044_v34 }
 0x2d8   : > { %v1473_v37 = vpop.eup %1472  ;;  %v1043_v38 = vadd.f32 1.0, %v1471_v36 }
 0x2d9   : > { %v1475_v39 = vpop.eup %1474  ;;  %v1046_v40 = vadd.f32 1.0, %v1473_v37 }
 0x2da   : > { %v1477_v41 = vpop.eup %1476  ;;  %1089 = vst.msk [vmem:[%s1745_s22 + $0x38] sm:$0xff] %vm1081_vm5, %v1475_v39  ;;  %1490 = vrcp.f32 %v1043_v38 }
 0x2db   : > { %1492 = vrcp.f32 %v1046_v40  ;;  %v1045_v42 = vadd.f32 1.0, %v1477_v41 }
 0x2dc   : > { %v1479_v43 = vpop.eup %1478 }
 0x2dd   : > { %v1481_v44 = vpop.eup %1480  ;;  %1088 = vst.msk [vmem:[%s1745_s22 + $0x30] sm:$0xff] %vm1081_vm5, %v1479_v43  ;;  %1494 = vrcp.f32 %v1045_v42 }
 0x2de   : > { %v1483_v45 = vpop.eup %1482  ;;  %1091 = vst.msk [vmem:[%s1745_s22 + $0x48] sm:$0xff] %vm1081_vm5, %v1481_v44 }
 0x2df   : > { %v1485_v46 = vpop.eup %1484  ;;  %v1048_v47 = vadd.f32 1.0, %v1483_v45 }
 0x2e0   : > { %v1487_v48 = vpop.eup %1486  ;;  %v1047_v49 = vadd.f32 1.0, %v1485_v46 }
 0x2e1   : > { %v1489_v50 = vpop.eup %1488  ;;  %1090 = vst.msk [vmem:[%s1745_s22 + $0x40] sm:$0xff] %vm1081_vm5, %v1487_v48  ;;  %1496 = vrcp.f32 %v1048_v47 }
 0x2e2   : > { %1093 = vst.msk [vmem:[%s1745_s22 + $0x58] sm:$0xff] %vm1081_vm5, %v1489_v50  ;;  %1498 = vrcp.f32 %v1047_v49 }
 0x2e4   : > { %v1491_v51 = vpop.eup %1490 }
 0x2e5   : > { %v1493_v52 = vpop.eup %1492  ;;  %1092 = vst.msk [vmem:[%s1745_s22 + $0x50] sm:$0xff] %vm1081_vm5, %v1491_v51 }
 0x2e6   : > { %1095 = vst.msk [vmem:[%s1745_s22 + $0x68] sm:$0xff] %vm1081_vm5, %v1493_v52 }
 0x2e7   : > { %v1495_v53 = vpop.eup %1494 }
 0x2e8   : > { %1094 = vst.msk [vmem:[%s1745_s22 + $0x60] sm:$0xff] %vm1081_vm5, %v1495_v53 }
 0x2eb   : > { %v1497_v54 = vpop.eup %1496 }
 0x2ec   : > { %v1499_v55 = vpop.eup %1498  ;;  %1097 = vst.msk [vmem:[%s1745_s22 + $0x78] sm:$0xff] %vm1081_vm5, %v1497_v54 }
 0x2ed   : > { %1096 = vst.msk [vmem:[%s1745_s22 + $0x70] sm:$0xff] %vm1081_vm5, %v1499_v55 }
 0x2ee PF: > { %s17_s24 = sadd.s32 1, %s1506_s24  }
 0x2ef   : > { %p14_p4 = scmp.ge.s32.totalorder %s17_s24, 4  }
 0x2f1   :  { %16 = sbr.rel (!%p14_p4) target bundleno = 1 (0x1), region = 78 }

</bundles_post_ra>
